<compile_context>
chip_gen: v6e
topology: v6e:2x2x1
jax: 0.10.0
libtpu: 0.0.40
codegen_flags: <defaults>
</compile_context>

<pallas_src>
import jax
import jax.numpy as jnp
from jax import lax
from jax.experimental import pallas as pl
from jax.experimental.pallas import tpu as pltpu


def mlp_kernel(x_ref, w1_ref, b1_ref, w2_ref, b2_ref, w3_ref, b3_ref,
               w4_ref, b4_ref, o_ref):
    bf16 = jnp.bfloat16
    f32 = jnp.float32

    # x arrives f32 from HBM (no wrapper cast/pad pass); bf16 cast happens on
    # the VPU here, hidden under MXU slack.
    x = x_ref[...].astype(bf16)                                   # (TB, D)

    # Layer 1: Linear(D, 128) + ReLU        (Dropout(0.3) identity in eval)
    h = jnp.dot(x, w1_ref[...], preferred_element_type=f32)
    h = jnp.maximum(h + b1_ref[...], 0.0)                         # (TB, 128) f32
    # Layer 2: Linear(128, 64) + ReLU       (Dropout(0.2) identity in eval)
    h = jnp.dot(h.astype(bf16), w2_ref[...], preferred_element_type=f32)
    h = jnp.maximum(h + b2_ref[...], 0.0)                         # (TB, 64) f32
    # Layer 3: Linear(64, 32) + ReLU
    h = jnp.dot(h.astype(bf16), w3_ref[...], preferred_element_type=f32)
    h = jnp.maximum(h + b3_ref[...], 0.0)                         # (TB, 32) f32
    # Layer 4: Linear(32, 1), folded into the lane-dense output row:
    #   (1, 32) . (TB, 32)^T  ->  (1, TB)   (batch lives on the 128-lane axis)
    y = lax.dot_general(w4_ref[...].astype(bf16), h.astype(bf16),
                        (((1,), (1,)), ((), ())),
                        preferred_element_type=f32)                # (1, TB)
    o_ref[...] = (y + b4_ref[...]).astype(o_ref.dtype)


# Knee from the review's suggested sweep {512,1024,2048,4096}: big enough that
# the ~0.35 us per-grid-step overhead is <10% of the MXU work, small enough
# that the f32 intermediates (h1 = TB*128 f32) don't start fighting the vreg
# file / store slots.  Multiple of 256 keeps the 256-wide MXU (v6e/v7x) full.
_TB_DEFAULT = 1024


def _pick_batch_tile(B):
    if B <= _TB_DEFAULT:
        # Single tile, rounded up to a 128-lane-friendly multiple of 128.
        return max(128, pl.cdiv(B, 128) * 128)
    return _TB_DEFAULT


def car_price_mlp_forward(x, params, batch_tile=None):
    """x: (B, D) float32. params: dict of weights/biases. Returns (B, 1) float32.

    Weights w1..w3 are stored (in_features, out_features) so the kernel computes
    x @ W + b (== PyTorch x @ W.T + b).  w4 is stored in PyTorch (out, in)=(1,32)
    layout so the head contracts directly into a lane-dense (1, TB) row.
    """
    B, D = x.shape

    if batch_tile is None:
        TB = _pick_batch_tile(B)
        num_tiles = pl.cdiv(B, TB)
        # v7x has 2 TensorCores; best-effort nudge toward an even "parallel"
        # tile count so both cores get work on large batches.
        if num_tiles > 1 and num_tiles % 2 == 1:
            TB_even = max(128, ((pl.cdiv(B, num_tiles + 1) + 127) // 128) * 128)
            if pl.cdiv(B, TB_even) % 2 == 0:
                TB = TB_even
    else:
        assert batch_tile % 128 == 0, "batch_tile must be a multiple of 128"
        TB = batch_tile
    num_tiles = pl.cdiv(B, TB)

    # Only the (tiny, non-B-scaling) weights are pre-cast to bf16; x stays f32.
    w1 = params["w1"].astype(jnp.bfloat16)
    w2 = params["w2"].astype(jnp.bfloat16)
    w3 = params["w3"].astype(jnp.bfloat16)
    b1, b2, b3 = params["b1"], params["b2"], params["b3"]
    w4, b4 = params["w4"], params["b4"]

    # Weights/biases: full-array block, constant index_map -> VMEM-resident,
    # DMA'd only once (block index never changes across the grid).
    const = lambda a: pl.BlockSpec(a.shape, lambda i: (0,) * a.ndim)

    # No padding of x: Pallas masks partial blocks, so the ragged tail tile
    # reads (harmless, sliced-away) garbage rows and masks the OOB output lanes.
    out = pl.pallas_call(
        mlp_kernel,
        out_shape=jax.ShapeDtypeStruct((1, B), jnp.float32),
        grid=(num_tiles,),
        in_specs=[
            pl.BlockSpec((TB, D), lambda i: (i, 0)),   # x: batch-tiled, pipelined
            const(w1), const(b1),
            const(w2), const(b2),
            const(w3), const(b3),
            const(w4), const(b4),
        ],
        out_specs=pl.BlockSpec((1, TB), lambda i: (0, i)),   # lane-dense output
        compiler_params=pltpu.CompilerParams(
            dimension_semantics=("parallel",),          # v7x: shard tiles on both TCs
            vmem_limit_bytes=32 * 1024 * 1024,          # far above the <2 MiB footprint
        ),
    )(x, w1, b1, w2, b2, w3, b3, w4, b4)

    # (1, B) row -> (B, 1) column (same linear order; metadata-only reshape).
    return out.reshape(B, 1)


def init_params(key, input_dim):
    """Deterministic init mimicking PyTorch nn.Linear defaults:
    U(-1/sqrt(fan_in), 1/sqrt(fan_in)).  w1..w3 stored (in, out); w4 stored (1, 32)."""
    shapes = [
        ("w1", (input_dim, 128), input_dim), ("b1", (1, 128), input_dim),
        ("w2", (128, 64), 128),              ("b2", (1, 64), 128),
        ("w3", (64, 32), 64),                ("b3", (1, 32), 64),
        ("w4", (1, 32), 32),                 ("b4", (1, 1), 32),
    ]
    params = {}
    for name, shape, fan_in in shapes:
        key, sub = jax.random.split(key)
        bound = 1.0 / (fan_in ** 0.5)
        params[name] = jax.random.uniform(sub, shape, jnp.float32, -bound, bound)
    return params


def reference_forward_bf16(x, params):
    """Pure-JAX reference with the same precision policy as the kernel
    (bf16 matmul inputs, f32 accumulation, f32 bias-add / ReLU)."""
    bf, f32 = jnp.bfloat16, jnp.float32
    h = jnp.dot(x.astype(bf), params["w1"].astype(bf), preferred_element_type=f32)
    h = jnp.maximum(h + params["b1"], 0.0)
    h = jnp.dot(h.astype(bf), params["w2"].astype(bf), preferred_element_type=f32)
    h = jnp.maximum(h + params["b2"], 0.0)
    h = jnp.dot(h.astype(bf), params["w3"].astype(bf), preferred_element_type=f32)
    h = jnp.maximum(h + params["b3"], 0.0)
    return jnp.dot(h.astype(bf), params["w4"].astype(bf).T,
                   preferred_element_type=f32) + params["b4"]


def reference_forward_f32(x, params):
    """Pure-f32 reference matching the PyTorch spec exactly (for a loose
    bf16-drift tolerance check)."""
    f32 = jnp.float32
    h = jnp.maximum(jnp.dot(x, params["w1"], preferred_element_type=f32) + params["b1"], 0.0)
    h = jnp.maximum(jnp.dot(h, params["w2"], preferred_element_type=f32) + params["b2"], 0.0)
    h = jnp.maximum(jnp.dot(h, params["w3"], preferred_element_type=f32) + params["b3"], 0.0)
    return jnp.dot(h, params["w4"].T, preferred_element_type=f32) + params["b4"]


if __name__ == "__main__":
    key = jax.random.PRNGKey(0)
    key, kx_small, kx_big = jax.random.split(key, 3)

    input_dim = 32  # e.g. one-hot encoded car features
    params = init_params(key, input_dim)

    # 1) Small batch (single partial 128-row tile, masked output lanes).
    x_small = jax.random.normal(kx_small, (8, input_dim), dtype=jnp.float32)
    y_small = jax.block_until_ready(car_price_mlp_forward(x_small, params))
    assert y_small.shape == (8, 1)
    assert jnp.allclose(y_small, reference_forward_bf16(x_small, params),
                        atol=1e-4, rtol=1e-4), "small-batch mismatch vs bf16-policy reference"
    assert jnp.allclose(y_small, reference_forward_f32(x_small, params),
                        atol=5e-2, rtol=5e-2), "small-batch drift vs pure-f32 reference"

    # 2) Ragged batch forced across multiple grid tiles (exercises pipelining,
    #    the partial tail tile and lane-masked output writes).
    x_big = jax.random.normal(kx_big, (300, input_dim), dtype=jnp.float32)
    y_big = jax.block_until_ready(car_price_mlp_forward(x_big, params, batch_tile=128))
    assert y_big.shape == (300, 1)
    assert jnp.allclose(y_big, reference_forward_bf16(x_big, params),
                        atol=1e-4, rtol=1e-4), "multi-tile batch mismatch vs bf16-policy reference"
    assert jnp.allclose(y_big, reference_forward_f32(x_big, params),
                        atol=5e-2, rtol=5e-2), "multi-tile batch drift vs pure-f32 reference"

    # 3) Same batch through the default (large-tile) path.
    y_big_default = jax.block_until_ready(car_price_mlp_forward(x_big, params))
    assert y_big_default.shape == (300, 1)
    assert jnp.allclose(y_big_default, reference_forward_bf16(x_big, params),
                        atol=1e-4, rtol=1e-4), "default-tile mismatch vs bf16-policy reference"

    print("KERNEL_OK")
</pallas_src>

<mosaic_0001>
module attributes {stable_mosaic.version = 11 : i64} {
  func.func @mlp_kernel(%arg0: i32, %arg1: memref<128x32xf32, #tpu.memory_space<vmem>>, %arg2: memref<32x128xbf16, #tpu.memory_space<vmem>>, %arg3: memref<1x128xf32, #tpu.memory_space<vmem>>, %arg4: memref<128x64xbf16, #tpu.memory_space<vmem>>, %arg5: memref<1x64xf32, #tpu.memory_space<vmem>>, %arg6: memref<64x32xbf16, #tpu.memory_space<vmem>>, %arg7: memref<1x32xf32, #tpu.memory_space<vmem>>, %arg8: memref<1x32xf32, #tpu.memory_space<vmem>>, %arg9: memref<1x1xf32, #tpu.memory_space<vmem>>, %arg10: memref<1x128xf32, #tpu.memory_space<vmem>>) attributes {dimension_semantics = [#tpu.dimension_semantics<parallel>], iteration_bounds = array<i64: 1>, scalar_prefetch = 0 : i64, scratch_operands = 0 : i64, tpu.core_type = #tpu.core_type<tc>, window_params = [{transform_indices = @transform_0, window_bounds = array<i64: 128, 32>}, {pipeline_mode = #tpu.pipeline_mode<synchronous>, transform_indices = @transform_1, window_bounds = array<i64: 32, 128>}, {pipeline_mode = #tpu.pipeline_mode<synchronous>, transform_indices = @transform_2, window_bounds = array<i64: 1, 128>}, {pipeline_mode = #tpu.pipeline_mode<synchronous>, transform_indices = @transform_3, window_bounds = array<i64: 128, 64>}, {pipeline_mode = #tpu.pipeline_mode<synchronous>, transform_indices = @transform_4, window_bounds = array<i64: 1, 64>}, {pipeline_mode = #tpu.pipeline_mode<synchronous>, transform_indices = @transform_5, window_bounds = array<i64: 64, 32>}, {pipeline_mode = #tpu.pipeline_mode<synchronous>, transform_indices = @transform_6, window_bounds = array<i64: 1, 32>}, {pipeline_mode = #tpu.pipeline_mode<synchronous>, transform_indices = @transform_7, window_bounds = array<i64: 1, 32>}, {pipeline_mode = #tpu.pipeline_mode<synchronous>, transform_indices = @transform_8, window_bounds = array<i64: 1, 1>}, {transform_indices = @transform_9, window_bounds = array<i64: 1, 128>}]} {
    %c0 = arith.constant 0 : index
    %c0_0 = arith.constant 0 : index
    %0 = vector.load %arg1[%c0, %c0_0] : memref<128x32xf32, #tpu.memory_space<vmem>>, vector<128x32xf32>
    %1 = arith.truncf %0 : vector<128x32xf32> to vector<128x32xbf16>
    %c0_1 = arith.constant 0 : index
    %c0_2 = arith.constant 0 : index
    %2 = vector.load %arg2[%c0_1, %c0_2] : memref<32x128xbf16, #tpu.memory_space<vmem>>, vector<32x128xbf16>
    %cst = arith.constant dense<0.000000e+00> : vector<128x128xf32>
    %3 = tpu.matmul %1, %2, %cst {dimension_numbers = #tpu.dot_dimension_numbers<[1], [0], [0], [1], [0, 0, 1, 1], [], []>} : vector<128x32xbf16>, vector<32x128xbf16>, vector<128x128xf32> -> vector<128x128xf32>
    %c0_3 = arith.constant 0 : index
    %c0_4 = arith.constant 0 : index
    %4 = vector.load %arg3[%c0_3, %c0_4] : memref<1x128xf32, #tpu.memory_space<vmem>>, vector<1x128xf32>
    %5 = vector.broadcast %4 : vector<1x128xf32> to vector<128x128xf32>
    %6 = arith.addf %3, %5 : vector<128x128xf32>
    %cst_5 = arith.constant 0.000000e+00 : f32
    %7 = vector.broadcast %cst_5 : f32 to vector<128x128xf32>
    %8 = arith.maximumf %6, %7 : vector<128x128xf32>
    %9 = arith.truncf %8 : vector<128x128xf32> to vector<128x128xbf16>
    %c0_6 = arith.constant 0 : index
    %c0_7 = arith.constant 0 : index
    %10 = vector.load %arg4[%c0_6, %c0_7] : memref<128x64xbf16, #tpu.memory_space<vmem>>, vector<128x64xbf16>
    %cst_8 = arith.constant dense<0.000000e+00> : vector<128x64xf32>
    %11 = tpu.matmul %9, %10, %cst_8 {dimension_numbers = #tpu.dot_dimension_numbers<[1], [0], [0], [1], [0, 0, 1, 1], [], []>} : vector<128x128xbf16>, vector<128x64xbf16>, vector<128x64xf32> -> vector<128x64xf32>
    %c0_9 = arith.constant 0 : index
    %c0_10 = arith.constant 0 : index
    %12 = vector.load %arg5[%c0_9, %c0_10] : memref<1x64xf32, #tpu.memory_space<vmem>>, vector<1x64xf32>
    %13 = vector.broadcast %12 : vector<1x64xf32> to vector<128x64xf32>
    %14 = arith.addf %11, %13 : vector<128x64xf32>
    %cst_11 = arith.constant 0.000000e+00 : f32
    %15 = vector.broadcast %cst_11 : f32 to vector<128x64xf32>
    %16 = arith.maximumf %14, %15 : vector<128x64xf32>
    %17 = arith.truncf %16 : vector<128x64xf32> to vector<128x64xbf16>
    %c0_12 = arith.constant 0 : index
    %c0_13 = arith.constant 0 : index
    %18 = vector.load %arg6[%c0_12, %c0_13] : memref<64x32xbf16, #tpu.memory_space<vmem>>, vector<64x32xbf16>
    %cst_14 = arith.constant dense<0.000000e+00> : vector<128x32xf32>
    %19 = tpu.matmul %17, %18, %cst_14 {dimension_numbers = #tpu.dot_dimension_numbers<[1], [0], [0], [1], [0, 0, 1, 1], [], []>} : vector<128x64xbf16>, vector<64x32xbf16>, vector<128x32xf32> -> vector<128x32xf32>
    %c0_15 = arith.constant 0 : index
    %c0_16 = arith.constant 0 : index
    %20 = vector.load %arg7[%c0_15, %c0_16] : memref<1x32xf32, #tpu.memory_space<vmem>>, vector<1x32xf32>
    %21 = vector.broadcast %20 : vector<1x32xf32> to vector<128x32xf32>
    %22 = arith.addf %19, %21 : vector<128x32xf32>
    %cst_17 = arith.constant 0.000000e+00 : f32
    %23 = vector.broadcast %cst_17 : f32 to vector<128x32xf32>
    %24 = arith.maximumf %22, %23 : vector<128x32xf32>
    %c0_18 = arith.constant 0 : index
    %c0_19 = arith.constant 0 : index
    %25 = vector.load %arg8[%c0_18, %c0_19] : memref<1x32xf32, #tpu.memory_space<vmem>>, vector<1x32xf32>
    %26 = arith.truncf %25 : vector<1x32xf32> to vector<1x32xbf16>
    %27 = arith.truncf %24 : vector<128x32xf32> to vector<128x32xbf16>
    %cst_20 = arith.constant dense<0.000000e+00> : vector<1x128xf32>
    %28 = tpu.matmul %26, %27, %cst_20 {dimension_numbers = #tpu.dot_dimension_numbers<[1], [1], [0], [0], [0, 0, 1, 0], [], []>} : vector<1x32xbf16>, vector<128x32xbf16>, vector<1x128xf32> -> vector<1x128xf32>
    %c0_21 = arith.constant 0 : index
    %c0_22 = arith.constant 0 : index
    %29 = vector.load %arg9[%c0_21, %c0_22] : memref<1x1xf32, #tpu.memory_space<vmem>>, vector<1x1xf32>
    %30 = vector.broadcast %29 : vector<1x1xf32> to vector<1x128xf32>
    %31 = arith.addf %28, %30 : vector<1x128xf32>
    %c0_23 = arith.constant 0 : index
    %c0_24 = arith.constant 0 : index
    %32 = vector.load %arg10[%c0_23, %c0_24] : memref<1x128xf32, #tpu.memory_space<vmem>>, vector<1x128xf32>
    tpu.vector_store %arg10[%c0_23, %c0_24], %31 {strides = array<i32>} : memref<1x128xf32, #tpu.memory_space<vmem>>, vector<1x128xf32>,
    return
  }
  func.func @transform_0(%arg0: i32) -> (i32, i32) {
    %c0_i32 = arith.constant 0 : i32
    %c0_i32_0 = arith.constant 0 : i32
    return %arg0, %c0_i32 : i32, i32
  }
  func.func @transform_1(%arg0: i32) -> (i32, i32) {
    %c0_i32 = arith.constant 0 : i32
    %c0_i32_0 = arith.constant 0 : i32
    %c0_i32_1 = arith.constant 0 : i32
    return %c0_i32, %c0_i32_0 : i32, i32
  }
  func.func @transform_2(%arg0: i32) -> (i32, i32) {
    %c0_i32 = arith.constant 0 : i32
    %c0_i32_0 = arith.constant 0 : i32
    %c0_i32_1 = arith.constant 0 : i32
    return %c0_i32, %c0_i32_0 : i32, i32
  }
  func.func @transform_3(%arg0: i32) -> (i32, i32) {
    %c0_i32 = arith.constant 0 : i32
    %c0_i32_0 = arith.constant 0 : i32
    %c0_i32_1 = arith.constant 0 : i32
    return %c0_i32, %c0_i32_0 : i32, i32
  }
  func.func @transform_4(%arg0: i32) -> (i32, i32) {
    %c0_i32 = arith.constant 0 : i32
    %c0_i32_0 = arith.constant 0 : i32
    %c0_i32_1 = arith.constant 0 : i32
    return %c0_i32, %c0_i32_0 : i32, i32
  }
  func.func @transform_5(%arg0: i32) -> (i32, i32) {
    %c0_i32 = arith.constant 0 : i32
    %c0_i32_0 = arith.constant 0 : i32
    %c0_i32_1 = arith.constant 0 : i32
    return %c0_i32, %c0_i32_0 : i32, i32
  }
  func.func @transform_6(%arg0: i32) -> (i32, i32) {
    %c0_i32 = arith.constant 0 : i32
    %c0_i32_0 = arith.constant 0 : i32
    %c0_i32_1 = arith.constant 0 : i32
    return %c0_i32, %c0_i32_0 : i32, i32
  }
  func.func @transform_7(%arg0: i32) -> (i32, i32) {
    %c0_i32 = arith.constant 0 : i32
    %c0_i32_0 = arith.constant 0 : i32
    %c0_i32_1 = arith.constant 0 : i32
    return %c0_i32, %c0_i32_0 : i32, i32
  }
  func.func @transform_8(%arg0: i32) -> (i32, i32) {
    %c0_i32 = arith.constant 0 : i32
    %c0_i32_0 = arith.constant 0 : i32
    %c0_i32_1 = arith.constant 0 : i32
    return %c0_i32, %c0_i32_0 : i32, i32
  }
  func.func @transform_9(%arg0: i32) -> (i32, i32) {
    %c0_i32 = arith.constant 0 : i32
    %c0_i32_0 = arith.constant 0 : i32
    return %c0_i32, %arg0 : i32, i32
  }
}

</mosaic_0001>

<bundles_post_ra>
// kernel: tpu_custom_call.1
= control target key start
LH: loop header
LB: loop body
LE: loop exit
PB: predicated region body
PF: predicated region fallthrough
CT: control target
= control target key end

     0   :  { %s1132_s0 = inlined_call_operand.vmem [shape: f32[8,32], index: 0, kind: input, shape index: {}]   ;;  %s1133_s1 = inlined_call_operand.vmem [shape: bf16[32,128], index: 1, kind: input, shape index: {}]   ;;  %s1134_s2 = inlined_call_operand.vmem [shape: f32[1,128], index: 2, kind: input, shape index: {}]   ;;  %s1135_s3 = inlined_call_operand.vmem [shape: bf16[128,64], index: 3, kind: input, shape index: {}]   ;;  %s1136_s4 = inlined_call_operand.vmem [shape: f32[1,64], index: 4, kind: input, shape index: {}]   ;;  %s1137_s5 = inlined_call_operand.vmem [shape: bf16[64,32], index: 5, kind: input, shape index: {}]   ;;  %s1138_s6 = inlined_call_operand.vmem [shape: f32[1,32], index: 6, kind: input, shape index: {}]   ;;  %s1139_s7 = inlined_call_operand.vmem [shape: f32[1,32], index: 7, kind: input, shape index: {}]   ;;  %s1140_s8 = inlined_call_operand.<no memory space> [shape: f32[1,1], index: 8, kind: input, shape index: {}]   ;;  %s1141_s9 = inlined_call_operand.hbm [shape: f32[1,8], index: 9, kind: output, shape index: {}]  }
   0x1   :  { %v14_v0 = vstv %s1140_s8 }
   0x2   :  { %15 = vst [vmem:[#allocation2] sm:$0x1] %v14_v0 }
   0x3   :  { %v882_v1 = vld [vmem:[%s1133_s1 + $0x8] sm:$0xff]   ;;  %v883_v2 = vld [vmem:[%s1133_s1] sm:$0xff]   ;;  %vm83_vm0 = vcmask 261120   ;;  %v38_v6 = vld [vmem:[%s1132_s0 + $0x10] sm:$0xff] }
   0x4   :  { %781 = vmatprep.subr.bf16.mxu0 %v882_v1  ;;  %v36_v3 = vld [vmem:[%s1132_s0] sm:$0xff]  ;;  %v37_v4 = vld [vmem:[%s1132_s0 + $0x8] sm:$0xff]  ;;  %v39_v7 = vld [vmem:[%s1132_s0 + $0x18] sm:$0xff] }
   0x5   :  { %782 = vmatpush3.bf16.msra.mxu0 %v882_v1  ;;  %v52_v5 = vpack.c.bf16 %v37_v4, %v36_v3  ;;  %v40_v8 = vld [vmem:[%s1132_s0 + $0x20] sm:$0xff]  ;;  %v41_v9 = vld [vmem:[%s1132_s0 + $0x28] sm:$0xff]  ;;  %v53_v10 = vpack.c.bf16 %v39_v7, %v38_v6  ;;  %v884_v12 = vld [vmem:[%s1135_s3 + $0x38] sm:$0xff]  }
   0x6   :  { %783 = vmatprep.subr.bf16.mxu0 %v883_v2  ;;  %v54_v11 = vpack.c.bf16 %v41_v9, %v40_v8  ;;  %v42_v13 = vld [vmem:[%s1132_s0 + $0x30] sm:$0xff]  ;;  %v43_v14 = vld [vmem:[%s1132_s0 + $0x38] sm:$0xff]  ;;  %v44_v16 = vld [vmem:[%s1132_s0 + $0x40] sm:$0xff]  ;;  %801 = vmatprep.subr.bf16.mxu1 %v884_v12 }
   0x7   :  { %785 = vmatprep.mubr.msk.bf16.mxu0 %vm83_vm0, %v52_v5  ;;  %v885_v15 = vld [vmem:[%s1135_s3 + $0x30] sm:$0xff]   ;;  %v45_v17 = vld [vmem:[%s1132_s0 + $0x48] sm:$0xff]  ;;  %802 = vmatpush3.bf16.msra.mxu1 %v884_v12  ;;  %v55_v19 = vpack.c.bf16 %v43_v14, %v42_v13  ;;  %v887_v20 = vld [vmem:[%s1135_s3 + $0x20] sm:$0xff]  }
   0x8   :  { %803 = vmatprep.subr.bf16.mxu1 %v885_v15  ;;  %v886_v18 = vld [vmem:[%s1135_s3 + $0x28] sm:$0xff]   ;;  %v56_v21 = vpack.c.bf16 %v45_v17, %v44_v16 }
   0x9   :  { %784 = vmatpush3.bf16.msra.mxu0 %v883_v2 }
   0xb   :  { %804 = vmatpush3.bf16.msra.mxu1 %v885_v15 }
   0xc   :  { %786 = vmatmul.mubr.msk.bf16.vlgmr.msra.gmra.mxu0 %vm83_vm0, %v53_v10  ;;  %805 = vmatprep.subr.bf16.mxu1 %v886_v18 }
   0xd   :  { %789 = vmatprep.mubr.msk.bf16.mxu0 %vm83_vm0, %v54_v11 }
   0xe   :  { %16 = vsyncpa [#allocation4], 0  ;;  %v46_v22 = vld [vmem:[%s1132_s0 + $0x50] sm:$0xff]  ;;  %v47_v23 = vld [vmem:[%s1132_s0 + $0x58] sm:$0xff]  ;;  %vm460_vm1 = vcmask 523264   ;;  %vm919_vm2 = vmmov 0  }
   0xf   :  { %806 = vmatpush3.bf16.msra.mxu1 %v886_v18  ;;  %v48_v24 = vld [vmem:[%s1132_s0 + $0x60] sm:$0xff]  ;;  %v49_v25 = vld [vmem:[%s1132_s0 + $0x68] sm:$0xff]  ;;  %v888_v26 = vld [vmem:[%s1135_s3 + $0x18] sm:$0xff]   ;;  %v57_v27 = vpack.c.bf16 %v47_v23, %v46_v22  ;;  %s921_s25 = smov [#allocation3]  }
  0x10   :  { %807 = vmatprep.subr.bf16.mxu1 %v887_v20  ;;  %v58_v28 = vpack.c.bf16 %v49_v25, %v48_v24  ;;  %v50_v29 = vld [vmem:[%s1132_s0 + $0x70] sm:$0xff]  ;;  %v51_v30 = vld [vmem:[%s1132_s0 + $0x78] sm:$0xff]  ;;  %v890_v33 = vld [vmem:[%s1135_s3 + $0x8] sm:$0xff]   ;;  %s692_s26 = sshll.u32 %s921_s25, 4  ;;  %s693_s26 = int_to_ptr.vmem [resolvable:$true] %s692_s26 }
  0x11   :  { %v59_v31 = vpack.c.bf16 %v51_v30, %v50_v29  ;;  %v889_v32 = vld [vmem:[%s1135_s3 + $0x10] sm:$0xff]   ;;  %v891_v34 = vld [vmem:[%s1135_s3] sm:$0xff]   ;;  %v892_v35 = vld [vmem:[%s1137_s5 + $0x18] sm:$0xff]   ;;  %s896_s27 = scalar_lea.vmem %s693_s26, 16  ;;  %s900_s28 = scalar_lea.vmem %s693_s26, 32 }
  0x12   :  { %v893_v36 = vld [vmem:[%s1137_s5 + $0x10] sm:$0xff]   ;;  %833 = vmatprep.subr.bf16.mxu0 %v892_v35  ;;  %v894_v37 = vld [vmem:[%s1137_s5 + $0x8] sm:$0xff]   ;;  %v700_v40 = vld [vmem:[%s1134_s2] ss:$0 sm:$0xff]  ;;  %p897_p0 = scmp.ne.s32.totalorder %s693_s26, %s896_s27  ;;  %p901_p1 = scmp.lt.s32.totalorder %s693_s26, %s693_s26 }
  0x13   :  { %808 = vmatpush3.bf16.msra.mxu1 %v887_v20  ;;  %834 = vmatpush3.bf16.msra.mxu0 %v892_v35  ;;  %p902_p2 = scmp.lt.s32.totalorder %s900_s28, %s896_s27 }
  0x14   :  { %790 = vmatmul.mubr.msk.bf16.gmra.mxu0 %vm83_vm0, %v55_v19  ;;  %809 = vmatprep.subr.bf16.mxu1 %v888_v26 }
  0x15   :  { %793 = vmatprep.mubr.msk.bf16.mxu0 %vm83_vm0, %v56_v21  ;;  %835 = vmatprep.subr.bf16.mxu0 %v893_v36  ;;  %p903_p3 = por %p902_p2, %p901_p1 }
  0x17   :  { %810 = vmatpush3.bf16.msra.mxu1 %v888_v26  ;;  %836 = vmatpush3.bf16.msra.mxu0 %v893_v36  ;;  %p904_p4 = pnand %p903_p3, %p897_p0 }
  0x18   :  { %811 = vmatprep.subr.bf16.mxu1 %v889_v32  ;;  %837 = vmatprep.subr.bf16.mxu0 %v894_v37 }
  0x1b   :  { %812 = vmatpush3.bf16.msra.mxu1 %v889_v32  ;;  %838 = vmatpush3.bf16.msra.mxu0 %v894_v37 }
  0x1c   :  { %794 = vmatmul.mubr.msk.bf16.gmra.mxu0 %vm83_vm0, %v57_v27  ;;  %813 = vmatprep.subr.bf16.mxu1 %v890_v33 }
  0x1d   :  { %797 = vmatprep.mubr.msk.bf16.mxu0 %vm83_vm0, %v58_v28 }
  0x1f   :  { %814 = vmatpush3.bf16.msra.mxu1 %v890_v33 }
  0x20   :  { %815 = vmatprep.subr.bf16.mxu1 %v891_v34 }
  0x23   :  { %816 = vmatpush3.bf16.msra.mxu1 %v891_v34  ;;  %v711_v34 = vld [vmem:[%s1136_s4] ss:$0 sm:$0xff] }
  0x24   :  { %798 = vmatmul.mubr.msk.bf16.gmra.mxu0 %vm83_vm0, %v59_v31  ;;  %v895_v31 = vld [vmem:[%s1137_s5] sm:$0xff]  }
  0x25   :  { %839 = vmatprep.subr.bf16.mxu0 %v895_v31 }
  0x26   :  { %840 = vmatpush3.bf16.msra.mxu0 %v895_v31 }
  0xcc   :  { %v787_v38 = vpop.f32.mrf.mxu0 }
  0xcd   :  { %v151_v44 = vadd.f32 %v787_v38, %v700_v40 }
  0xce   :  { %v142_v39 = vpop.f32.mrf.mxu0 }
  0xcf   :  { %v143_v42 = vadd.f32 %v700_v40, %v142_v39  ;;  %v207_v51 = vmax.f32 %v151_v44, 0.0 }
  0xd0   :  { %v788_v41 = vpop.f32.mrf.mxu0 }
  0xd1   :  { %v154_v43 = vadd.f32 %v788_v41, %v700_v40  ;;  %v205_v49 = vmax.f32 %v143_v42, 0.0 }
  0xd2   :  { %v145_v45 = vpop.f32.mrf.mxu0 }
  0xd3   :  { %v146_v46 = vadd.f32 %v700_v40, %v145_v45  ;;  %v208_v47 = vmax.f32 %v154_v43, 0.0 }
  0xd4   :  { %v791_v48 = vpop.f32.mrf.mxu0 }
  0xd5   :  { %v206_v50 = vmax.f32 %v146_v46, 0.0  ;;  %v222_v54 = vpack.c.bf16 %v208_v47, %v207_v51  ;;  %v167_v58 = vadd.f32 %v791_v48, %v700_v40 }
  0xd6   :  { %v158_v52 = vpop.f32.mrf.mxu0 }
  0xd7   :  { %v221_v53 = vpack.c.bf16 %v206_v50, %v205_v49  ;;  %v159_v56 = vadd.f32 %v700_v40, %v158_v52  ;;  %v211_v1 = vmax.f32 %v167_v58, 0.0 }
  0xd8   :  { %v792_v55 = vpop.f32.mrf.mxu0 }
  0xd9   :  { %v170_v57 = vadd.f32 %v792_v55, %v700_v40  ;;  %817 = vmatprep.mubr.bf16.mxu1 %v221_v53  ;;  %v209_v63 = vmax.f32 %v159_v56, 0.0 }
  0xda   :  { %v161_v59 = vpop.f32.mrf.mxu0  ;;  %818 = vmatmul.mubr.bf16.vlgmr.msra.gmra.mxu1 %v222_v54 }
  0xdb   :  { %v162_v60 = vadd.f32 %v700_v40, %v161_v59  ;;  %v212_v61 = vmax.f32 %v170_v57, 0.0 }
  0xdc   :  { %v795_v62 = vpop.f32.mrf.mxu0 }
  0xdd   :  { %v210_v0 = vmax.f32 %v162_v60, 0.0  ;;  %v224_v4 = vpack.c.bf16 %v212_v61, %v211_v1  ;;  %v183_v8 = vadd.f32 %v795_v62, %v700_v40 }
  0xde   :  { %v174_v2 = vpop.f32.mrf.mxu0 }
  0xdf   :  { %v223_v3 = vpack.c.bf16 %v210_v0, %v209_v63  ;;  %v175_v6 = vadd.f32 %v700_v40, %v174_v2  ;;  %v215_v15 = vmax.f32 %v183_v8, 0.0 }
  0xe0   :  { %v796_v5 = vpop.f32.mrf.mxu0 }
  0xe1   :  { %v186_v7 = vadd.f32 %v796_v5, %v700_v40  ;;  %821 = vmatprep.mubr.bf16.mxu1 %v223_v3  ;;  %v213_v13 = vmax.f32 %v175_v6, 0.0 }
  0xe2   :  { %v177_v9 = vpop.f32.mrf.mxu0  ;;  %822 = vmatmul.mubr.bf16.gmra.mxu1 %v224_v4 }
  0xe3   :  { %v178_v10 = vadd.f32 %v700_v40, %v177_v9  ;;  %v216_v11 = vmax.f32 %v186_v7, 0.0 }
  0xe4   :  { %v799_v12 = vpop.f32.mrf.mxu0 }
  0xe5   :  { %v214_v14 = vmax.f32 %v178_v10, 0.0  ;;  %v226_v18 = vpack.c.bf16 %v216_v11, %v215_v15  ;;  %v199_v22 = vadd.f32 %v799_v12, %v700_v40 }
  0xe6   :  { %v190_v16 = vpop.f32.mrf.mxu0 }
  0xe7   :  { %v225_v17 = vpack.c.bf16 %v214_v14, %v213_v13  ;;  %v191_v20 = vadd.f32 %v700_v40, %v190_v16  ;;  %v219_v28 = vmax.f32 %v199_v22, 0.0 }
  0xe8   :  { %v800_v19 = vpop.f32.mrf.mxu0 }
  0xe9   :  { %v202_v21 = vadd.f32 %v800_v19, %v700_v40  ;;  %825 = vmatprep.mubr.bf16.mxu1 %v225_v17  ;;  %v217_v26 = vmax.f32 %v191_v20, 0.0 }
  0xea   :  { %v193_v23 = vpop.f32.mrf.mxu0  ;;  %826 = vmatmul.mubr.bf16.gmra.mxu1 %v226_v18 }
  0xeb   :  { %v194_v24 = vadd.f32 %v700_v40, %v193_v23  ;;  %v220_v25 = vmax.f32 %v202_v21, 0.0 }
  0xed   :  { %v218_v27 = vmax.f32 %v194_v24, 0.0  ;;  %v228_v30 = vpack.c.bf16 %v220_v25, %v219_v28  ;;  %v918_v25 = vmov 0.0  }
  0xee   :  { %857 = vmatprep.subr.bf16.mxu1 %v918_v25 }
  0xef   :  { %v227_v29 = vpack.c.bf16 %v218_v27, %v217_v26  ;;  %v608_v26 = vld [vmem:[#allocation2] sm:$0x1]  ;;  %v920_v27 = vmov 0  }
  0xf0   :  { %881 = vset.pattern.permute.xlu0 %v920_v27 }
  0xf1   :  { %829 = vmatprep.mubr.bf16.mxu1 %v227_v29  ;;  %611 = vperm.xlu0 %881, %v608_v26   ;;  %v1092_v29 = vld [vmem:[%s1138_s6] ss:$0 sm:$0xff] }
  0xf2   :  { %830 = vmatmul.mubr.bf16.gmra.mxu1 %v228_v30 }
  0xf3   :  { %873 = vmatprep.mubr.msk.bf16.mxu1 %vm919_vm2, %v918_v25 }
 0x19a   :  { %v819_v32 = vpop.f32.mrf.mxu1 }
 0x19b   :  { %v343_v38 = vadd.f32 %v819_v32, %v711_v34 }
 0x19c   :  { %v334_v33 = vpop.f32.mrf.mxu1 }
 0x19d   :  { %v335_v36 = vadd.f32 %v711_v34, %v334_v33  ;;  %v399_v45 = vmax.f32 %v343_v38, 0.0 }
 0x19e   :  { %v820_v35 = vpop.f32.mrf.mxu1 }
 0x19f   :  { %v346_v37 = vadd.f32 %v820_v35, %v711_v34  ;;  %v397_v43 = vmax.f32 %v335_v36, 0.0 }
 0x1a0   :  { %v337_v39 = vpop.f32.mrf.mxu1 }
 0x1a1   :  { %v338_v40 = vadd.f32 %v711_v34, %v337_v39  ;;  %v400_v41 = vmax.f32 %v346_v37, 0.0 }
 0x1a2   :  { %v823_v42 = vpop.f32.mrf.mxu1 }
 0x1a3   :  { %v398_v44 = vmax.f32 %v338_v40, 0.0  ;;  %v414_v48 = vpack.c.bf16 %v400_v41, %v399_v45  ;;  %v359_v52 = vadd.f32 %v823_v42, %v711_v34 }
 0x1a4   :  { %v350_v46 = vpop.f32.mrf.mxu1 }
 0x1a5   :  { %v413_v47 = vpack.c.bf16 %v398_v44, %v397_v43  ;;  %v351_v50 = vadd.f32 %v711_v34, %v350_v46  ;;  %v403_v59 = vmax.f32 %v359_v52, 0.0 }
 0x1a6   :  { %v824_v49 = vpop.f32.mrf.mxu1 }
 0x1a7   :  { %v362_v51 = vadd.f32 %v824_v49, %v711_v34  ;;  %841 = vmatprep.mubr.msk.bf16.mxu0 %vm460_vm1, %v413_v47  ;;  %v401_v57 = vmax.f32 %v351_v50, 0.0 }
 0x1a8   :  { %v353_v53 = vpop.f32.mrf.mxu1  ;;  %842 = vmatmul.mubr.msk.bf16.vlgmr.msra.gmra.mxu0 %vm460_vm1, %v414_v48 }
 0x1a9   :  { %v354_v54 = vadd.f32 %v711_v34, %v353_v53  ;;  %v404_v55 = vmax.f32 %v362_v51, 0.0 }
 0x1aa   :  { %v827_v56 = vpop.f32.mrf.mxu1 }
 0x1ab   :  { %v402_v58 = vmax.f32 %v354_v54, 0.0  ;;  %v416_v62 = vpack.c.bf16 %v404_v55, %v403_v59  ;;  %v375_v2 = vadd.f32 %v827_v56, %v711_v34 }
 0x1ac   :  { %v366_v60 = vpop.f32.mrf.mxu1 }
 0x1ad   :  { %v415_v61 = vpack.c.bf16 %v402_v58, %v401_v57  ;;  %v367_v0 = vadd.f32 %v711_v34, %v366_v60  ;;  %v407_v9 = vmax.f32 %v375_v2, 0.0 }
 0x1ae   :  { %v828_v63 = vpop.f32.mrf.mxu1 }
 0x1af   :  { %v378_v1 = vadd.f32 %v828_v63, %v711_v34  ;;  %845 = vmatprep.mubr.msk.bf16.mxu0 %vm460_vm1, %v415_v61  ;;  %v405_v7 = vmax.f32 %v367_v0, 0.0 }
 0x1b0   :  { %v369_v3 = vpop.f32.mrf.mxu1  ;;  %846 = vmatmul.mubr.msk.bf16.gmra.mxu0 %vm460_vm1, %v416_v62 }
 0x1b1   :  { %v370_v4 = vadd.f32 %v711_v34, %v369_v3  ;;  %v408_v5 = vmax.f32 %v378_v1, 0.0 }
 0x1b2   :  { %v831_v6 = vpop.f32.mrf.mxu1 }
 0x1b3   :  { %v406_v8 = vmax.f32 %v370_v4, 0.0  ;;  %v418_v12 = vpack.c.bf16 %v408_v5, %v407_v9  ;;  %v391_v16 = vadd.f32 %v831_v6, %v711_v34 }
 0x1b4   :  { %v382_v10 = vpop.f32.mrf.mxu1 }
 0x1b5   :  { %v417_v11 = vpack.c.bf16 %v406_v8, %v405_v7  ;;  %v383_v14 = vadd.f32 %v711_v34, %v382_v10  ;;  %v411_v22 = vmax.f32 %v391_v16, 0.0 }
 0x1b6   :  { %v832_v13 = vpop.f32.mrf.mxu1 }
 0x1b7   :  { %v394_v15 = vadd.f32 %v832_v13, %v711_v34  ;;  %849 = vmatprep.mubr.msk.bf16.mxu0 %vm460_vm1, %v417_v11  ;;  %v409_v20 = vmax.f32 %v383_v14, 0.0 }
 0x1b8   :  { %v385_v17 = vpop.f32.mrf.mxu1  ;;  %850 = vmatmul.mubr.msk.bf16.gmra.mxu0 %vm460_vm1, %v418_v12 }
 0x1b9   :  { %v386_v18 = vadd.f32 %v711_v34, %v385_v17  ;;  %v412_v19 = vmax.f32 %v394_v15, 0.0 }
 0x1bb   :  { %v410_v21 = vmax.f32 %v386_v18, 0.0  ;;  %v420_v24 = vpack.c.bf16 %v412_v19, %v411_v22 }
 0x1bd   :  { %v419_v23 = vpack.c.bf16 %v410_v21, %v409_v20 }
 0x1bf   :  { %853 = vmatprep.mubr.msk.bf16.mxu0 %vm460_vm1, %v419_v23 }
 0x1c0   :  { %854 = vmatmul.mubr.msk.bf16.gmra.mxu0 %vm460_vm1, %v420_v24 }
 0x268   :  { %v843_v28 = vpop.f32.mrf.mxu0 }
 0x269   :  { %v528_v31 = vadd.f32 %v843_v28, %v1092_v29 }
 0x26a   :  { %v519_v30 = vpop.f32.mrf.mxu0 }
 0x26b   :  { %v520_v33 = vadd.f32 %v1092_v29, %v519_v30  ;;  %v584_v36 = vmax.f32 %v528_v31, 0.0  ;;  %v598_v30 = vld [vmem:[%s1139_s7] sm:$0x1] }
 0x26c   :  { %v844_v32 = vpop.f32.mrf.mxu0  ;;  %v599_v31 = vpack.c.bf16 %v598_v30, %v598_v30 }
 0x26d   :  { %v531_v34 = vadd.f32 %v844_v32, %v1092_v29  ;;  %v582_v40 = vmax.f32 %v520_v33, 0.0  ;;  %v614_v32 = vlaneseq }
 0x26e   :  { %v522_v35 = vpop.f32.mrf.mxu0 }
 0x26f   :  { %v585_v37 = vmax.f32 %v531_v34, 0.0  ;;  %v523_v38 = vadd.f32 %v1092_v29, %v522_v35  ;;  %v615_v33 = vshrl.u32 %v614_v32, 7  ;;  %v612_v35 = vpop.permute.xlu0 %611 }
 0x270   :  { %v847_v39 = vpop.f32.mrf.mxu0 }
 0x271   :  { %v601_v41 = vpack.c.bf16 %v585_v37, %v584_v36  ;;  %v583_v42 = vmax.f32 %v523_v38, 0.0  ;;  %v544_v15 = vadd.f32 %v847_v39, %v1092_v29  ;;  %v616_v34 = vsub.s32 0, %v615_v33 }
 0x272   :  { %v535_v43 = vpop.f32.mrf.mxu0 }
 0x273   :  { %v600_v44 = vpack.c.bf16 %v583_v42, %v582_v40  ;;  %v588_v18 = vmax.f32 %v544_v15, 0.0  ;;  %v536_v21 = vadd.f32 %v1092_v29, %v535_v43  ;;  %v625_v28 = vsel %vm83_vm0, %v601_v41, 0 }
 0x274   :  { %v848_v45 = vpop.f32.mrf.mxu0  ;;  %v617_v36 = vrot.slane %v612_v35, %v616_v34 }
 0x275   :  { %v547_v13 = vadd.f32 %v848_v45, %v1092_v29  ;;  %v586_v24 = vmax.f32 %v536_v21, 0.0 }
 0x276   :  { %v538_v46 = vpop.f32.mrf.mxu0 }
 0x277   :  { %v589_v16 = vmax.f32 %v547_v13, 0.0  ;;  %v539_v20 = vadd.f32 %v1092_v29, %v538_v46 }
 0x278   :  { %v851_v47 = vpop.f32.mrf.mxu0 }
 0x279   :  { %v560_v3 = vadd.f32 %v851_v47, %v1092_v29  ;;  %v603_v19 = vpack.c.bf16 %v589_v16, %v588_v18  ;;  %v587_v22 = vmax.f32 %v539_v20, 0.0 }
 0x27a   :  { %v551_v48 = vpop.f32.mrf.mxu0 }
 0x27b   :  { %v592_v6 = vmax.f32 %v560_v3, 0.0  ;;  %v552_v9 = vadd.f32 %v1092_v29, %v551_v48  ;;  %v631_v23 = vsel %vm83_vm0, %v603_v19, 0  ;;  %v602_v26 = vpack.c.bf16 %v587_v22, %v586_v24 }
 0x27c   :  { %v852_v49 = vpop.f32.mrf.mxu0 }
 0x27d   :  { %v563_v1 = vadd.f32 %v852_v49, %v1092_v29  ;;  %v590_v12 = vmax.f32 %v552_v9, 0.0  ;;  %v628_v27 = vsel %vm83_vm0, %v602_v26, 0 }
 0x27e   :  { %v554_v50 = vpop.f32.mrf.mxu0 }
 0x27f   :  { %v593_v4 = vmax.f32 %v563_v1, 0.0  ;;  %v555_v8 = vadd.f32 %v1092_v29, %v554_v50 }
 0x280   :  { %v855_v51 = vpop.f32.mrf.mxu0 }
 0x281   :  { %v576_v53 = vadd.f32 %v855_v51, %v1092_v29  ;;  %v605_v7 = vpack.c.bf16 %v593_v4, %v592_v6  ;;  %v591_v10 = vmax.f32 %v555_v8, 0.0 }
 0x282   :  { %v567_v52 = vpop.f32.mrf.mxu0 }
 0x283   :  { %v596_v57 = vmax.f32 %v576_v53, 0.0  ;;  %v568_v60 = vadd.f32 %v1092_v29, %v567_v52  ;;  %v637_v11 = vsel %vm83_vm0, %v605_v7, 0  ;;  %v604_v14 = vpack.c.bf16 %v591_v10, %v590_v12 }
 0x284   :  { %v856_v54 = vpop.f32.mrf.mxu0 }
 0x285   :  { %v579_v55 = vadd.f32 %v856_v54, %v1092_v29  ;;  %v594_v0 = vmax.f32 %v568_v60, 0.0  ;;  %v634_v17 = vsel %vm83_vm0, %v604_v14, 0 }
 0x286   :  { %v570_v56 = vpop.f32.mrf.mxu0 }
 0x287   :  { %v597_v58 = vmax.f32 %v579_v55, 0.0  ;;  %v571_v59 = vadd.f32 %v1092_v29, %v570_v56  ;;  %v622_v29 = vsel %vm83_vm0, %v600_v44, 0 }
 0x289   :  { %v607_v61 = vpack.c.bf16 %v597_v58, %v596_v57  ;;  %v595_v62 = vmax.f32 %v571_v59, 0.0 }
 0x28b   :  { %v643_v63 = vsel %vm83_vm0, %v607_v61, 0  ;;  %v606_v2 = vpack.c.bf16 %v595_v62, %v594_v0 }
 0x28c   :  { %858 = vmatpush3.bf16.xpose.msra.mxu1 %v643_v63 }
 0x28d   :  { %859 = vmatprep.subr.bf16.mxu1 %v918_v25  ;;  %v640_v5 = vsel %vm83_vm0, %v606_v2, 0 }
 0x294   :  { %860 = vmatpush3.bf16.xpose.msra.mxu1 %v640_v5 }
 0x295   :  { %861 = vmatprep.subr.bf16.mxu1 %v918_v25 }
 0x29c   :  { %862 = vmatpush3.bf16.xpose.msra.mxu1 %v637_v11 }
 0x29d   :  { %863 = vmatprep.subr.bf16.mxu1 %v918_v25 }
 0x2a4   :  { %864 = vmatpush3.bf16.xpose.msra.mxu1 %v634_v17 }
 0x2a5   :  { %865 = vmatprep.subr.bf16.mxu1 %v918_v25 }
 0x2ac   :  { %866 = vmatpush3.bf16.xpose.msra.mxu1 %v631_v23 }
 0x2ad   :  { %867 = vmatprep.subr.bf16.mxu1 %v918_v25 }
 0x2b4   :  { %868 = vmatpush3.bf16.xpose.msra.mxu1 %v628_v27 }
 0x2b5   :  { %869 = vmatprep.subr.bf16.mxu1 %v918_v25 }
 0x2bc   :  { %870 = vmatpush3.bf16.xpose.msra.mxu1 %v625_v28 }
 0x2bd   :  { %871 = vmatprep.subr.bf16.mxu1 %v918_v25 }
 0x2c4   :  { %872 = vmatpush3.bf16.xpose.msra.mxu1 %v622_v29 }
 0x2cb   :  { %874 = vmatmul.mubr.msk.bf16.vlgmr.msra.gmra.mxu1 %vm83_vm0, %v599_v31 }
 0x38b   :  { %v679_v37 = vpop.f32.mrf.mxu1 }
 0x38c   :  { %v680_v38 = vadd.f32 %v679_v37, %v617_v36 }
 0x38d   :  { %v875_v25 = vpop.f32.mrf.mxu1 }
 0x38e   :  { %685 = vst [vmem:[#allocation3] sm:$0x1] %v680_v38 }
 0x38f   :  { %v682_v39 = vpop.f32.mrf.mxu1 }
 0x390   :  { %907 = shalt.err (!%p904_p4)
}
 0x391   :  { %695 = dma.vmem_to_hbm [thread:$0]  %s693_s26, 16, %s1141_s9, [#allocation4]   ;;  %v876_v40 = vpop.f32.mrf.mxu1 }
 0x392   :  { %916 = dma.done.wait [#allocation4], 16  }
 0x393   :  { %917 = vsyncadd [#allocation4], 4294967280 }
 0x394   :  { %699 = vsyncpa [#allocation4], 1 }

</bundles_post_ra>
